<compile_context>
chip_gen: v7x
topology: tpu7x:2x2x1
jax: 0.10.0
libtpu: 0.0.40
codegen_flags: <defaults>
</compile_context>

<pallas_src>
import functools

import jax
import jax.numpy as jnp
from jax import lax
from jax.experimental import pallas as pl
from jax.experimental.pallas import tpu as pltpu


def _vmem_capacity_bytes():
    try:
        return int(pltpu.get_tpu_info().vmem_capacity_bytes)
    except Exception:
        return 64 << 20  # conservative (v7x-sized) default


def _buffered_one():
    # Capability check (no broad runtime fallback): single-buffer constant-index weights.
    if not hasattr(pl, "Buffered"):
        return None
    try:
        return pl.Buffered(1)
    except Exception:
        return None


_BUFFERED_ONE = _buffered_one()


def _weight_spec(shape, index_map):
    if _BUFFERED_ONE is not None:
        return pl.BlockSpec(shape, index_map, pipeline_mode=_BUFFERED_ONE)
    return pl.BlockSpec(shape, index_map)


def _clamp_vmem(nbytes, cap):
    return int(min(max(nbytes, 32 << 20), int(cap * 0.9)))


# ---------------------------------------------------------------------------
# Pass 1: head-major K/V projection: (B, S, E) -> 2 x (B, H, S, E) bf16
# ---------------------------------------------------------------------------
def _kv_project_kernel(x_ref, wk_ref, wv_ref, bk_ref, bv_ref, k_ref, v_ref, *, n_heads):
    f32, bf16 = jnp.float32, jnp.bfloat16
    xb = x_ref[0].astype(bf16)                                     # (tkv, E)
    for h in range(n_heads):
        k_h = jnp.dot(xb, wk_ref[h], preferred_element_type=f32) + bk_ref[h]
        v_h = jnp.dot(xb, wv_ref[h], preferred_element_type=f32) + bv_ref[h]
        k_ref[0, h] = k_h.astype(bf16)
        v_ref[0, h] = v_h.astype(bf16)


# ---------------------------------------------------------------------------
# Pass 2: per-(batch, query-tile) attention + summarize + FFN + 2x LayerNorm
# ---------------------------------------------------------------------------
def _attention_ffn_kernel(lengths_ref, x_ref, k_ref, v_ref, wq_ref, bq_ref,
                          wsum_ref, w1_ref, w2_ref, vec_ref, o_ref,
                          *, n_heads, tq, seq_len, use_mask):
    f32, bf16 = jnp.float32, jnp.bfloat16
    S = k_ref.shape[2]                 # padded sequence length
    E = x_ref.shape[2]

    xq = x_ref[0].astype(f32)          # (tq, E) residual path
    xq_bf = xq.astype(bf16)

    vec = vec_ref[...]                 # (1, 10E) packed small params
    bsum = vec[:, 0:E]
    g1 = vec[:, E:2 * E]
    bt1 = vec[:, 2 * E:3 * E]
    b1 = vec[:, 3 * E:7 * E]
    b2 = vec[:, 7 * E:8 * E]
    g2 = vec[:, 8 * E:9 * E]
    bt2 = vec[:, 9 * E:10 * E]

    if use_mask:
        length = lengths_ref[pl.program_id(0)]
        q_start = pl.program_id(1) * tq
        rows = lax.broadcasted_iota(jnp.int32, (tq, S), 0) + q_start
        cols = lax.broadcasted_iota(jnp.int32, (tq, S), 1)
        valid = (rows < length) & (cols < length)
        # Padded key columns (>= real seq_len) get a much more negative fill so that a
        # fully-masked query row reproduces PyTorch's uniform softmax over the REAL keys.
        fill = jnp.where(cols < seq_len, jnp.float32(-1e9), jnp.float32(-1e30))

    # Per-head attention (head-major: per-head access = leading-axis index, no lane slices).
    heads = []
    for h in range(n_heads):
        # 1/sqrt(E) is already folded into wq / bq at weight-prep time.
        q_h = (jnp.dot(xq_bf, wq_ref[h], preferred_element_type=f32)
               + bq_ref[h]).astype(bf16)                           # (tq, E)
        k_h = k_ref[0, h]                                          # (S, E) bf16
        v_h = v_ref[0, h]                                          # (S, E) bf16
        scores = lax.dot_general(q_h, k_h, (((1,), (1,)), ((), ())),
                                 preferred_element_type=f32)       # (tq, S)
        if use_mask:
            scores = jnp.where(valid, scores, fill)
        m = jnp.max(scores, axis=-1, keepdims=True)
        e = jnp.exp(scores - m)
        denom = jnp.sum(e, axis=-1, keepdims=True)
        p = (e * pl.reciprocal(denom, approx=False)).astype(bf16)  # exact softmax
        heads.append(jnp.dot(p, v_h, preferred_element_type=f32))  # (tq, E)

    # Lane-contiguous multi-head output -> ONE big-K summarize GEMM.
    multi = jnp.concatenate(heads, axis=-1).astype(bf16)           # (tq, H*E)
    attn = jnp.dot(multi, wsum_ref[...], preferred_element_type=f32) + bsum

    # Residual + LayerNorm 1 (f32).
    h1 = xq + attn
    mu1 = jnp.mean(h1, axis=-1, keepdims=True)
    var1 = jnp.mean(jnp.square(h1 - mu1), axis=-1, keepdims=True)
    h1 = (h1 - mu1) * lax.rsqrt(var1 + 1e-5) * g1 + bt1

    # FeedForward: Linear(E, 4E) -> ReLU -> Linear(4E, E); bf16 MXU, f32 accumulation.
    ff = jnp.dot(h1.astype(bf16), w1_ref[...], preferred_element_type=f32) + b1
    ff = jnp.maximum(ff, 0.0)
    ff = jnp.dot(ff.astype(bf16), w2_ref[...], preferred_element_type=f32) + b2

    # Residual + LayerNorm 2 (f32).
    h2 = h1 + ff
    mu2 = jnp.mean(h2, axis=-1, keepdims=True)
    var2 = jnp.mean(jnp.square(h2 - mu2), axis=-1, keepdims=True)
    out = (h2 - mu2) * lax.rsqrt(var2 + 1e-5) * g2 + bt2

    o_ref[0] = out.astype(o_ref.dtype)


# ---------------------------------------------------------------------------
# Wrapper
# ---------------------------------------------------------------------------
def encoder_block(x, params, event_lengths=None, *, n_heads):
    B, S, E = x.shape
    H = n_heads
    HE = H * E
    F = 4 * E
    f32, bf16 = jnp.float32, jnp.bfloat16

    vmem_cap = _vmem_capacity_bytes()
    # Bigger query tiles on 128-MiB-VMEM chips (v5e/v6e); 128 on v7x (64 MiB per TC).
    target_tq = 256 if vmem_cap >= (100 << 20) else 128
    if S <= target_tq:
        tq, s_pad = S, S
    else:
        tq = target_tq
        s_pad = ((S + tq - 1) // tq) * tq
    nq = s_pad // tq
    padded = s_pad != S
    use_mask = (event_lengths is not None) or padded

    if event_lengths is None:
        lengths = jnp.full((B,), S, jnp.int32)
    else:
        lengths = event_lengths.astype(jnp.int32)

    x_in = x
    if padded:
        x_in = jnp.pad(x_in, ((0, 0), (0, s_pad - S), (0, 0)))

    # Weight prep: bf16 matmul operands, f32 vectors; fold 1/sqrt(E) into the Q projection.
    scale = 1.0 / (float(E) ** 0.5)
    wq = (params["wq"] * scale).astype(bf16)                       # (H, E, E)
    bq = (params["bq"] * scale).reshape(H, 1, E).astype(f32)
    wk = params["wk"].astype(bf16)
    bk = params["bk"].reshape(H, 1, E).astype(f32)
    wv = params["wv"].astype(bf16)
    bv = params["bv"].reshape(H, 1, E).astype(f32)
    wsum = params["wsum"].astype(bf16)                             # (H*E, E)
    w1 = params["w1"].astype(bf16)                                 # (E, 4E)
    w2 = params["w2"].astype(bf16)                                 # (4E, E)
    vec = jnp.concatenate([
        params["bsum"], params["g1"], params["bt1"], params["b1"],
        params["b2"], params["g2"], params["bt2"]]).reshape(1, 10 * E).astype(f32)

    # ----- pass 1: head-major K/V projection -> (B, H, s_pad, E) bf16 in HBM -----
    kv_est = (2 * (wk.size + wv.size) * 2 + (bk.size + bv.size) * 4
              + 4 * tq * E * 4 + 4 * H * tq * E * 2 + 4 * H * tq * E * 4 + (8 << 20))
    k_hm, v_hm = pl.pallas_call(
        functools.partial(_kv_project_kernel, n_heads=H),
        out_shape=(jax.ShapeDtypeStruct((B, H, s_pad, E), bf16),
                   jax.ShapeDtypeStruct((B, H, s_pad, E), bf16)),
        grid_spec=pltpu.PrefetchScalarGridSpec(
            num_scalar_prefetch=0,
            grid=(B, nq),
            in_specs=[
                pl.BlockSpec((1, tq, E), lambda b, si: (b, si, 0)),
                _weight_spec((H, E, E), lambda b, si: (0, 0, 0)),
                _weight_spec((H, E, E), lambda b, si: (0, 0, 0)),
                pl.BlockSpec((H, 1, E), lambda b, si: (0, 0, 0)),
                pl.BlockSpec((H, 1, E), lambda b, si: (0, 0, 0)),
            ],
            out_specs=[
                pl.BlockSpec((1, H, tq, E), lambda b, si: (b, 0, si, 0)),
                pl.BlockSpec((1, H, tq, E), lambda b, si: (b, 0, si, 0)),
            ]),
        compiler_params=pltpu.CompilerParams(
            dimension_semantics=("parallel", "parallel"),
            vmem_limit_bytes=_clamp_vmem(kv_est, vmem_cap)),
    )(x_in, wk, wv, bk, bv)

    # ----- pass 2: attention + summarize + FFN + LayerNorms per (batch, query tile) -----
    weight_bytes = (wq.size + wsum.size + w1.size + w2.size) * 2 + (bq.size + vec.size) * 4
    kv_bytes = 2 * 2 * H * s_pad * E * 2                 # K + V blocks, double-buffered
    io_bytes = 4 * tq * E * x.dtype.itemsize             # x tile + out tile, double-buffered
    interm = tq * (4 * s_pad + 4 * HE + 16 * E + 8 * F) * 4
    main_est = 2 * weight_bytes + kv_bytes + io_bytes + interm + (8 << 20)

    out = pl.pallas_call(
        functools.partial(_attention_ffn_kernel, n_heads=H, tq=tq,
                          seq_len=S, use_mask=use_mask),
        out_shape=jax.ShapeDtypeStruct((B, s_pad, E), x.dtype),
        grid_spec=pltpu.PrefetchScalarGridSpec(
            num_scalar_prefetch=1,
            grid=(B, nq),
            in_specs=[
                pl.BlockSpec((1, tq, E), lambda b, qi, lens: (b, qi, 0)),
                pl.BlockSpec((1, H, s_pad, E), lambda b, qi, lens: (b, 0, 0, 0)),
                pl.BlockSpec((1, H, s_pad, E), lambda b, qi, lens: (b, 0, 0, 0)),
                _weight_spec((H, E, E), lambda b, qi, lens: (0, 0, 0)),
                pl.BlockSpec((H, 1, E), lambda b, qi, lens: (0, 0, 0)),
                _weight_spec((HE, E), lambda b, qi, lens: (0, 0)),
                _weight_spec((E, F), lambda b, qi, lens: (0, 0)),
                _weight_spec((F, E), lambda b, qi, lens: (0, 0)),
                pl.BlockSpec((1, 10 * E), lambda b, qi, lens: (0, 0)),
            ],
            out_specs=pl.BlockSpec((1, tq, E), lambda b, qi, lens: (b, qi, 0))),
        compiler_params=pltpu.CompilerParams(
            dimension_semantics=("parallel", "parallel"),
            vmem_limit_bytes=_clamp_vmem(main_est, vmem_cap)),
    )(lengths, x_in, k_hm, v_hm, wq, bq, wsum, w1, w2, vec)

    if padded:
        out = out[:, :S, :]
    return out


# ---------------------------------------------------------------------------
# Pure-JAX reference (mirrors the PyTorch forward in eval mode, with the same
# bf16-operand / f32-accumulation matmul numerics as the kernel).
# ---------------------------------------------------------------------------
def _reference(x, params, event_lengths, n_heads):
    B, S, E = x.shape
    f32, bf16 = jnp.float32, jnp.bfloat16
    scale = 1.0 / (float(E) ** 0.5)
    x_bf = x.astype(bf16)
    heads = []
    for h in range(n_heads):
        q = jnp.dot(x_bf, params["wq"][h].astype(bf16),
                    preferred_element_type=f32) + params["bq"][h]
        k = jnp.dot(x_bf, params["wk"][h].astype(bf16),
                    preferred_element_type=f32) + params["bk"][h]
        v = jnp.dot(x_bf, params["wv"][h].astype(bf16),
                    preferred_element_type=f32) + params["bv"][h]
        s = jnp.einsum("bqe,bke->bqk", q.astype(bf16), k.astype(bf16),
                       preferred_element_type=f32) * scale
        if event_lengths is not None:
            rows = jnp.arange(S)[None, :, None]
            cols = jnp.arange(S)[None, None, :]
            lens = event_lengths[:, None, None]
            mask = (rows < lens) & (cols < lens)
            s = jnp.where(mask, s, -1e9)
        p = jax.nn.softmax(s, axis=-1)
        heads.append(jnp.einsum("bqk,bke->bqe", p.astype(bf16), v.astype(bf16),
                                preferred_element_type=f32))
    multi = jnp.concatenate(heads, axis=-1).astype(bf16)
    a_out = jnp.dot(multi, params["wsum"].astype(bf16),
                    preferred_element_type=f32) + params["bsum"]

    def ln(h, g, b):
        mu = jnp.mean(h, axis=-1, keepdims=True)
        var = jnp.mean((h - mu) ** 2, axis=-1, keepdims=True)
        return (h - mu) * lax.rsqrt(var + 1e-5) * g + b

    h1 = ln(x.astype(f32) + a_out, params["g1"], params["bt1"])
    ff = jnp.dot(h1.astype(bf16), params["w1"].astype(bf16),
                 preferred_element_type=f32) + params["b1"]
    ff = jnp.maximum(ff, 0.0)
    ff = jnp.dot(ff.astype(bf16), params["w2"].astype(bf16),
                 preferred_element_type=f32) + params["b2"]
    return ln(h1 + ff, params["g2"], params["bt2"])


def init_params(key, embedding_dim, n_heads):
    E, H = embedding_dim, n_heads
    ks = jax.random.split(key, 12)
    s = lambda fan_in: 1.0 / jnp.sqrt(jnp.float32(fan_in))
    # Linear weights stored already transposed: (in, out), so y = x @ W + b.
    return {
        "wq": jax.random.normal(ks[0], (H, E, E), jnp.float32) * s(E),
        "bq": jax.random.normal(ks[1], (H, E), jnp.float32) * 0.01,
        "wk": jax.random.normal(ks[2], (H, E, E), jnp.float32) * s(E),
        "bk": jax.random.normal(ks[3], (H, E), jnp.float32) * 0.01,
        "wv": jax.random.normal(ks[4], (H, E, E), jnp.float32) * s(E),
        "bv": jax.random.normal(ks[5], (H, E), jnp.float32) * 0.01,
        "wsum": jax.random.normal(ks[6], (H * E, E), jnp.float32) * s(H * E),
        "bsum": jax.random.normal(ks[7], (E,), jnp.float32) * 0.01,
        "g1": jnp.ones((E,), jnp.float32),
        "bt1": jnp.zeros((E,), jnp.float32),
        "w1": jax.random.normal(ks[8], (E, 4 * E), jnp.float32) * s(E),
        "b1": jax.random.normal(ks[9], (4 * E,), jnp.float32) * 0.01,
        "w2": jax.random.normal(ks[10], (4 * E, E), jnp.float32) * s(4 * E),
        "b2": jax.random.normal(ks[11], (E,), jnp.float32) * 0.01,
        "g2": jnp.ones((E,), jnp.float32),
        "bt2": jnp.zeros((E,), jnp.float32),
    }


if __name__ == "__main__":
    B, S, E, H = 2, 8, 32, 2
    key = jax.random.PRNGKey(0)
    k_x, k_p = jax.random.split(key)
    x = jax.random.normal(k_x, (B, S, E), jnp.float32)
    params = init_params(k_p, E, H)
    event_lengths = jnp.array([5, 8], dtype=jnp.int32)

    # Tolerance accounts for bf16 MXU operands (kernel folds 1/sqrt(E) into wq, the
    # reference scales scores afterwards) on top of exact-f32 softmax/LayerNorm math.
    ATOL = RTOL = 5e-2

    # Masked path.
    out = jax.block_until_ready(
        encoder_block(x, params, event_lengths=event_lengths, n_heads=H))
    ref = _reference(x, params, event_lengths, H)
    assert out.shape == (B, S, E)
    assert jnp.allclose(out, ref, atol=ATOL, rtol=RTOL), \
        float(jnp.max(jnp.abs(out - ref)))

    # Unmasked (event_lengths=None) path.
    out2 = jax.block_until_ready(encoder_block(x, params, n_heads=H))
    ref2 = _reference(x, params, None, H)
    assert jnp.allclose(out2, ref2, atol=ATOL, rtol=RTOL), \
        float(jnp.max(jnp.abs(out2 - ref2)))

    # Longer, non-tile-aligned sequence -> exercises the padded query-tile path.
    B2, S2 = 1, 300
    x2 = jax.random.normal(jax.random.PRNGKey(1), (B2, S2, E), jnp.float32)
    lens2 = jnp.array([170], dtype=jnp.int32)
    out3 = jax.block_until_ready(
        encoder_block(x2, params, event_lengths=lens2, n_heads=H))
    ref3 = _reference(x2, params, lens2, H)
    assert out3.shape == (B2, S2, E)
    assert jnp.allclose(out3, ref3, atol=ATOL, rtol=RTOL), \
        float(jnp.max(jnp.abs(out3 - ref3)))

    print("KERNEL_OK")
</pallas_src>

<mosaic_0001>
module attributes {stable_mosaic.version = 11 : i64} {
  func.func @_kv_project_kernel(%arg0: i32, %arg1: i32, %arg2: memref<1x8x32xf32, #tpu.memory_space<vmem>>, %arg3: memref<2x32x32xbf16, #tpu.memory_space<vmem>>, %arg4: memref<2x32x32xbf16, #tpu.memory_space<vmem>>, %arg5: memref<2x1x32xf32, #tpu.memory_space<vmem>>, %arg6: memref<2x1x32xf32, #tpu.memory_space<vmem>>, %arg7: memref<1x2x8x32xbf16, #tpu.memory_space<vmem>>, %arg8: memref<1x2x8x32xbf16, #tpu.memory_space<vmem>>) attributes {dimension_semantics = [#tpu.dimension_semantics<parallel>, #tpu.dimension_semantics<parallel>], iteration_bounds = array<i64: 2, 1>, scalar_prefetch = 0 : i64, scratch_operands = 0 : i64, tpu.core_type = #tpu.core_type<tc>, window_params = [{transform_indices = @transform_0, window_bounds = array<i64: 1, 8, 32>}, {pipeline_mode = #tpu.pipeline_mode<synchronous>, transform_indices = @transform_1, window_bounds = array<i64: 2, 32, 32>}, {pipeline_mode = #tpu.pipeline_mode<synchronous>, transform_indices = @transform_2, window_bounds = array<i64: 2, 32, 32>}, {pipeline_mode = #tpu.pipeline_mode<synchronous>, transform_indices = @transform_3, window_bounds = array<i64: 2, 1, 32>}, {pipeline_mode = #tpu.pipeline_mode<synchronous>, transform_indices = @transform_4, window_bounds = array<i64: 2, 1, 32>}, {transform_indices = @transform_5, window_bounds = array<i64: 1, 2, 8, 32>}, {transform_indices = @transform_6, window_bounds = array<i64: 1, 2, 8, 32>}]} {
    %c0 = arith.constant 0 : index
    %c0_0 = arith.constant 0 : index
    %c0_1 = arith.constant 0 : index
    %0 = vector.load %arg2[%c0, %c0_0, %c0_1] : memref<1x8x32xf32, #tpu.memory_space<vmem>>, vector<1x8x32xf32>
    %1 = vector.shape_cast %0 : vector<1x8x32xf32> to vector<8x32xf32>
    %2 = arith.truncf %1 : vector<8x32xf32> to vector<8x32xbf16>
    %c0_2 = arith.constant 0 : index
    %c0_3 = arith.constant 0 : index
    %c0_4 = arith.constant 0 : index
    %3 = vector.load %arg3[%c0_2, %c0_3, %c0_4] : memref<2x32x32xbf16, #tpu.memory_space<vmem>>, vector<1x32x32xbf16>
    %4 = vector.shape_cast %3 : vector<1x32x32xbf16> to vector<32x32xbf16>
    %cst = arith.constant dense<0.000000e+00> : vector<8x32xf32>
    %5 = tpu.matmul %2, %4, %cst {dimension_numbers = #tpu.dot_dimension_numbers<[1], [0], [0], [1], [0, 0, 1, 1], [], []>} : vector<8x32xbf16>, vector<32x32xbf16>, vector<8x32xf32> -> vector<8x32xf32>
    %c0_5 = arith.constant 0 : index
    %c0_6 = arith.constant 0 : index
    %c0_7 = arith.constant 0 : index
    %6 = vector.load %arg5[%c0_5, %c0_6, %c0_7] : memref<2x1x32xf32, #tpu.memory_space<vmem>>, vector<1x1x32xf32>
    %7 = vector.shape_cast %6 : vector<1x1x32xf32> to vector<1x32xf32>
    %8 = vector.broadcast %7 : vector<1x32xf32> to vector<8x32xf32>
    %9 = arith.addf %5, %8 : vector<8x32xf32>
    %c0_8 = arith.constant 0 : index
    %c0_9 = arith.constant 0 : index
    %c0_10 = arith.constant 0 : index
    %10 = vector.load %arg4[%c0_8, %c0_9, %c0_10] : memref<2x32x32xbf16, #tpu.memory_space<vmem>>, vector<1x32x32xbf16>
    %11 = vector.shape_cast %10 : vector<1x32x32xbf16> to vector<32x32xbf16>
    %cst_11 = arith.constant dense<0.000000e+00> : vector<8x32xf32>
    %12 = tpu.matmul %2, %11, %cst_11 {dimension_numbers = #tpu.dot_dimension_numbers<[1], [0], [0], [1], [0, 0, 1, 1], [], []>} : vector<8x32xbf16>, vector<32x32xbf16>, vector<8x32xf32> -> vector<8x32xf32>
    %c0_12 = arith.constant 0 : index
    %c0_13 = arith.constant 0 : index
    %c0_14 = arith.constant 0 : index
    %13 = vector.load %arg6[%c0_12, %c0_13, %c0_14] : memref<2x1x32xf32, #tpu.memory_space<vmem>>, vector<1x1x32xf32>
    %14 = vector.shape_cast %13 : vector<1x1x32xf32> to vector<1x32xf32>
    %15 = vector.broadcast %14 : vector<1x32xf32> to vector<8x32xf32>
    %16 = arith.addf %12, %15 : vector<8x32xf32>
    %17 = arith.truncf %9 : vector<8x32xf32> to vector<8x32xbf16>
    %c0_15 = arith.constant 0 : index
    %c0_16 = arith.constant 0 : index
    %c0_17 = arith.constant 0 : index
    %c0_18 = arith.constant 0 : index
    %18 = vector.load %arg7[%c0_15, %c0_16, %c0_17, %c0_18] : memref<1x2x8x32xbf16, #tpu.memory_space<vmem>>, vector<1x1x8x32xbf16>
    %19 = vector.shape_cast %18 : vector<1x1x8x32xbf16> to vector<8x32xbf16>
    %20 = vector.shape_cast %17 : vector<8x32xbf16> to vector<1x1x8x32xbf16>
    tpu.vector_store %arg7[%c0_15, %c0_16, %c0_17, %c0_18], %20 {strides = array<i32>} : memref<1x2x8x32xbf16, #tpu.memory_space<vmem>>, vector<1x1x8x32xbf16>,
    %21 = arith.truncf %16 : vector<8x32xf32> to vector<8x32xbf16>
    %c0_19 = arith.constant 0 : index
    %c0_20 = arith.constant 0 : index
    %c0_21 = arith.constant 0 : index
    %c0_22 = arith.constant 0 : index
    %22 = vector.load %arg8[%c0_19, %c0_20, %c0_21, %c0_22] : memref<1x2x8x32xbf16, #tpu.memory_space<vmem>>, vector<1x1x8x32xbf16>
    %23 = vector.shape_cast %22 : vector<1x1x8x32xbf16> to vector<8x32xbf16>
    %24 = vector.shape_cast %21 : vector<8x32xbf16> to vector<1x1x8x32xbf16>
    tpu.vector_store %arg8[%c0_19, %c0_20, %c0_21, %c0_22], %24 {strides = array<i32>} : memref<1x2x8x32xbf16, #tpu.memory_space<vmem>>, vector<1x1x8x32xbf16>,
    %c1 = arith.constant 1 : index
    %c0_23 = arith.constant 0 : index
    %c0_24 = arith.constant 0 : index
    %25 = vector.load %arg3[%c1, %c0_23, %c0_24] : memref<2x32x32xbf16, #tpu.memory_space<vmem>>, vector<1x32x32xbf16>
    %26 = vector.shape_cast %25 : vector<1x32x32xbf16> to vector<32x32xbf16>
    %cst_25 = arith.constant dense<0.000000e+00> : vector<8x32xf32>
    %27 = tpu.matmul %2, %26, %cst_25 {dimension_numbers = #tpu.dot_dimension_numbers<[1], [0], [0], [1], [0, 0, 1, 1], [], []>} : vector<8x32xbf16>, vector<32x32xbf16>, vector<8x32xf32> -> vector<8x32xf32>
    %c1_26 = arith.constant 1 : index
    %c0_27 = arith.constant 0 : index
    %c0_28 = arith.constant 0 : index
    %28 = vector.load %arg5[%c1_26, %c0_27, %c0_28] : memref<2x1x32xf32, #tpu.memory_space<vmem>>, vector<1x1x32xf32>
    %29 = vector.shape_cast %28 : vector<1x1x32xf32> to vector<1x32xf32>
    %30 = vector.broadcast %29 : vector<1x32xf32> to vector<8x32xf32>
    %31 = arith.addf %27, %30 : vector<8x32xf32>
    %c1_29 = arith.constant 1 : index
    %c0_30 = arith.constant 0 : index
    %c0_31 = arith.constant 0 : index
    %32 = vector.load %arg4[%c1_29, %c0_30, %c0_31] : memref<2x32x32xbf16, #tpu.memory_space<vmem>>, vector<1x32x32xbf16>
    %33 = vector.shape_cast %32 : vector<1x32x32xbf16> to vector<32x32xbf16>
    %cst_32 = arith.constant dense<0.000000e+00> : vector<8x32xf32>
    %34 = tpu.matmul %2, %33, %cst_32 {dimension_numbers = #tpu.dot_dimension_numbers<[1], [0], [0], [1], [0, 0, 1, 1], [], []>} : vector<8x32xbf16>, vector<32x32xbf16>, vector<8x32xf32> -> vector<8x32xf32>
    %c1_33 = arith.constant 1 : index
    %c0_34 = arith.constant 0 : index
    %c0_35 = arith.constant 0 : index
    %35 = vector.load %arg6[%c1_33, %c0_34, %c0_35] : memref<2x1x32xf32, #tpu.memory_space<vmem>>, vector<1x1x32xf32>
    %36 = vector.shape_cast %35 : vector<1x1x32xf32> to vector<1x32xf32>
    %37 = vector.broadcast %36 : vector<1x32xf32> to vector<8x32xf32>
    %38 = arith.addf %34, %37 : vector<8x32xf32>
    %39 = arith.truncf %31 : vector<8x32xf32> to vector<8x32xbf16>
    %c0_36 = arith.constant 0 : index
    %c1_37 = arith.constant 1 : index
    %c0_38 = arith.constant 0 : index
    %c0_39 = arith.constant 0 : index
    %40 = vector.load %arg7[%c0_36, %c1_37, %c0_38, %c0_39] : memref<1x2x8x32xbf16, #tpu.memory_space<vmem>>, vector<1x1x8x32xbf16>
    %41 = vector.shape_cast %40 : vector<1x1x8x32xbf16> to vector<8x32xbf16>
    %42 = vector.shape_cast %39 : vector<8x32xbf16> to vector<1x1x8x32xbf16>
    tpu.vector_store %arg7[%c0_36, %c1_37, %c0_38, %c0_39], %42 {strides = array<i32>} : memref<1x2x8x32xbf16, #tpu.memory_space<vmem>>, vector<1x1x8x32xbf16>,
    %43 = arith.truncf %38 : vector<8x32xf32> to vector<8x32xbf16>
    %c0_40 = arith.constant 0 : index
    %c1_41 = arith.constant 1 : index
    %c0_42 = arith.constant 0 : index
    %c0_43 = arith.constant 0 : index
    %44 = vector.load %arg8[%c0_40, %c1_41, %c0_42, %c0_43] : memref<1x2x8x32xbf16, #tpu.memory_space<vmem>>, vector<1x1x8x32xbf16>
    %45 = vector.shape_cast %44 : vector<1x1x8x32xbf16> to vector<8x32xbf16>
    %46 = vector.shape_cast %43 : vector<8x32xbf16> to vector<1x1x8x32xbf16>
    tpu.vector_store %arg8[%c0_40, %c1_41, %c0_42, %c0_43], %46 {strides = array<i32>} : memref<1x2x8x32xbf16, #tpu.memory_space<vmem>>, vector<1x1x8x32xbf16>,
    return
  }
  func.func @transform_0(%arg0: i32, %arg1: i32) -> (i32, i32, i32) {
    %c0_i32 = arith.constant 0 : i32
    %c0_i32_0 = arith.constant 0 : i32
    return %arg0, %arg1, %c0_i32 : i32, i32, i32
  }
  func.func @transform_1(%arg0: i32, %arg1: i32) -> (i32, i32, i32) {
    %c0_i32 = arith.constant 0 : i32
    %c0_i32_0 = arith.constant 0 : i32
    %c0_i32_1 = arith.constant 0 : i32
    %c0_i32_2 = arith.constant 0 : i32
    return %c0_i32, %c0_i32_0, %c0_i32_1 : i32, i32, i32
  }
  func.func @transform_2(%arg0: i32, %arg1: i32) -> (i32, i32, i32) {
    %c0_i32 = arith.constant 0 : i32
    %c0_i32_0 = arith.constant 0 : i32
    %c0_i32_1 = arith.constant 0 : i32
    %c0_i32_2 = arith.constant 0 : i32
    return %c0_i32, %c0_i32_0, %c0_i32_1 : i32, i32, i32
  }
  func.func @transform_3(%arg0: i32, %arg1: i32) -> (i32, i32, i32) {
    %c0_i32 = arith.constant 0 : i32
    %c0_i32_0 = arith.constant 0 : i32
    %c0_i32_1 = arith.constant 0 : i32
    %c0_i32_2 = arith.constant 0 : i32
    return %c0_i32, %c0_i32_0, %c0_i32_1 : i32, i32, i32
  }
  func.func @transform_4(%arg0: i32, %arg1: i32) -> (i32, i32, i32) {
    %c0_i32 = arith.constant 0 : i32
    %c0_i32_0 = arith.constant 0 : i32
    %c0_i32_1 = arith.constant 0 : i32
    %c0_i32_2 = arith.constant 0 : i32
    return %c0_i32, %c0_i32_0, %c0_i32_1 : i32, i32, i32
  }
  func.func @transform_5(%arg0: i32, %arg1: i32) -> (i32, i32, i32, i32) {
    %c0_i32 = arith.constant 0 : i32
    %c0_i32_0 = arith.constant 0 : i32
    %c0_i32_1 = arith.constant 0 : i32
    return %arg0, %c0_i32, %arg1, %c0_i32_0 : i32, i32, i32, i32
  }
  func.func @transform_6(%arg0: i32, %arg1: i32) -> (i32, i32, i32, i32) {
    %c0_i32 = arith.constant 0 : i32
    %c0_i32_0 = arith.constant 0 : i32
    %c0_i32_1 = arith.constant 0 : i32
    return %arg0, %c0_i32, %arg1, %c0_i32_0 : i32, i32, i32, i32
  }
}

</mosaic_0001>

<bundles_post_ra>
// kernel: tpu_custom_call.1
= control target key start
LH: loop header
LB: loop body
LE: loop exit
PB: predicated region body
PF: predicated region fallthrough
CT: control target
= control target key end

     0   :  { %12 = vsyncpa [#allocation3], 0  ;;  %s1534_s0 = inlined_call_operand.hbm [shape: f32[2,8,32], index: 0, kind: input, shape index: {}]   ;;  %s1535_s1 = inlined_call_operand.hbm [shape: bf16[2,32,32], index: 1, kind: input, shape index: {}]   ;;  %s1536_s2 = inlined_call_operand.hbm [shape: bf16[2,32,32], index: 2, kind: input, shape index: {}]   ;;  %s1537_s3 = inlined_call_operand.vmem [shape: f32[2,1,32], index: 3, kind: input, shape index: {}]   ;;  %s1538_s4 = inlined_call_operand.vmem [shape: f32[2,1,32], index: 4, kind: input, shape index: {}]   ;;  %s1539_s5 = inlined_call_operand.hbm [shape: bf16[2,2,8,32], index: 5, kind: output, shape index: {0}]   ;;  %s1540_s6 = inlined_call_operand.hbm [shape: bf16[2,2,8,32], index: 6, kind: output, shape index: {1}]  }
   0x1   :  { %14 = vsyncpa [#allocation3 + $0x1], 0 }
   0x2   :  { %15 = vsyncpa [#allocation6], 0 }
   0x3   :  { %16 = vsyncpa [#allocation4], 0 }
   0x4   :  { %18 = vsyncpa [#allocation4 + $0x1], 0 }
   0x5   :  { %19 = vsyncpa [#allocation10], 0 }
   0x6   :  { %21 = vsyncpa [#allocation10 + $0x1], 0  ;;  %s1216_s21 = smov 0   ;;  %s1218_s22 = smov 0  }
   0x7   :  { %s1220_s23 = smov 0   ;;  %s1222_s24 = smov 0  }
   0x8   :  { %s1224_s25 = smov 0   ;;  %s1226_s26 = smov 0  }
   0x9 LB: > { %s774_s27 = sadd.s32 4294967295, %s1168_s26   ;;  %s775_s28 = sadd.s32 4294967294, %s1168_s26   ;;  %s1168_s26 = sphi %s1226_s26, %s27_s26   ;;  %s1164_s25 = sphi %s1224_s25, %s1565_s25   ;;  %s1160_s24 = sphi %s1222_s24, %s1564_s24   ;;  %s1156_s23 = sphi %s1220_s23, %s1563_s23   ;;  %s1152_s22 = sphi %s1218_s22, %s1562_s22   ;;  %s1148_s21 = sphi %s1216_s21, %s1561_s21  }
   0xa   : > { %p61_p0 = scmp.ne.s32.totalorder %s1152_s22, %s1148_s21  ;;  %p1250_p1 = scmp.eq.s32.totalorder %s774_s27, 0 }
   0xb   : > { %p1254_p2 = scmp.eq.s32.totalorder %s774_s27, 1  ;;  %p177_p3 = scmp.eq.s32.totalorder %s775_s28, 1 }
   0xc   : > { %s1546_s29 = scalar_select %p1250_p1, 1, 0 }
   0xd   : > { %p1260_p4 = por %p1250_p1, %p61_p0  ;;  %p776_p5 = scmp.ge.s32.totalorder %s1168_s26, 1 }
   0xe   : > { %p1265_p6 = por %p177_p3, %p61_p0  ;;  %p212_p7 = scmp.lt.s32.totalorder %s1168_s26, 3 }
   0xf   : > { %s1548_s7 = scalar_select %p1260_p4, 1, 0 }
  0x10   : > { %s1549_s8 = scalar_select %p1265_p6, 1, 0 }
  0x11   : > { %p1270_p8 = pnand %p776_p5, %p212_p7  ;;  %s1170_s10 = smov [#allocation5]  }
  0x12   : > { %1550 = sst [smem:[#allocation15_spill]] %s1549_s8  ;;  %s224_s11 = sshll.u32 %s1170_s10, 4  ;;  %s1274_s11 = int_to_ptr.vmem [resolvable:$true] %s224_s11 }
  0x13   : > { %p876_p9 = pneg %p1270_p8  ;;  %s1171_s13 = smov [#allocation7]  }
  0x14   : > { %s237_s14 = sshll.u32 %s1171_s13, 4  ;;  %s964_s17 = scalar_lea.hbm %s1535_s1, 512  ;;  %s1285_s14 = int_to_ptr.vmem [resolvable:$true] %s237_s14 }
  0x15   : > { %p1281_p11 = pnand %p876_p9, %p1250_p1  ;;  %p965_p12 = scmp.ne.s32.totalorder %s1535_s1, %s964_s17 }
  0x16   : > { %p971_p5 = scmp.lt.u32.totalorder %s964_s17, %s1535_s1 }
  0x17   : > { %p966_p13 = pneg %p1281_p11 }
  0x19   : > { %p967_p0 = pnand %p966_p13, %p965_p12 }
  0x1b   : > { %p968_p3 = pneg %p967_p0 }
  0x1d   : > { %p973_p7 = pnand %p971_p5, %p968_p3 }
  0x1f   : > { %976 = shalt.err (!%p973_p7)
}
  0x20   : > { %s977_s28 = scalar_lea.vmem %s1274_s11, 512  ;;  %p985_p1 = scmp.lt.s32.totalorder %s1274_s11, %s1274_s11 }
  0x21   : > { %p978_p9 = scmp.ne.s32.totalorder %s1274_s11, %s977_s28  ;;  %p986_p12 = scmp.lt.s32.totalorder %s977_s28, %s977_s28 }
  0x23   : > { %p980_p10 = pnand %p978_p9, %p966_p13  ;;  %p987_p0 = por %p986_p12, %p985_p1 }
  0x25   : > { %p981_p6 = pneg %p980_p10 }
  0x27   : > { %p988_p4 = pnand %p987_p0, %p981_p6 }
  0x29   : > { %991 = shalt.err (!%p988_p4)
}
  0x2a   : > { %s1172_s10 = smov 64   ;;  %s1173_s13 = smov 4  }
  0x2b   : > { %879 = dma.hbm_to_vmem [thread:$0]  (!%p1281_p11), %s1535_s1, 512, %s1274_s11, [#allocation6], %s1172_s10, %s1172_s10, %s1173_s13  }
  0x2c   : > { %s992_s19 = scalar_lea.hbm %s1536_s2, 512 }
  0x2d   : > { %p993_p1 = scmp.ne.s32.totalorder %s1536_s2, %s992_s19  ;;  %p999_p10 = scmp.lt.u32.totalorder %s992_s19, %s1536_s2 }
  0x2f   : > { %p995_p4 = pnand %p993_p1, %p966_p13 }
  0x31   : > { %p996_p6 = pneg %p995_p4 }
  0x33   : > { %p1001_p3 = pnand %p999_p10, %p996_p6 }
  0x35   : > { %1004 = shalt.err (!%p1001_p3)
}
  0x36   : > { %s1005_s11 = scalar_lea.vmem %s1285_s14, 512  ;;  %p1013_p12 = scmp.lt.s32.totalorder %s1285_s14, %s1285_s14 }
  0x37   : > { %p1006_p5 = scmp.ne.s32.totalorder %s1285_s14, %s1005_s11  ;;  %p1014_p0 = scmp.lt.s32.totalorder %s1005_s11, %s1005_s11 }
  0x39   : > { %p1008_p7 = pnand %p1006_p5, %p966_p13  ;;  %p1015_p1 = por %p1014_p0, %p1013_p12 }
  0x3b   : > { %p1009_p9 = pneg %p1008_p7 }
  0x3d   : > { %p1016_p4 = pnand %p1015_p1, %p1009_p9 }
  0x3f   : > { %1019 = shalt.err (!%p1016_p4)
}
  0x40   : > { %882 = dma.hbm_to_vmem [thread:$0]  (!%p1281_p11), %s1536_s2, 512, %s1285_s14, [#allocation6], %s1172_s10, %s1172_s10, %s1173_s13  }
  0x41   : > { %s39_s16 = sadd.s32 1, %s1164_s25  ;;  %s48_s17 = sadd.s32 1, %s1156_s23 }
  0x42   : > { %p41_p13 = scmp.ge.s32.totalorder %s39_s16, 2  ;;  %p55_p6 = scmp.ne.s32.totalorder %s1156_s23, %s1152_s22 }
  0x43   : > { %p56_p10 = scmp.eq.s32.totalorder %s1168_s26, 0  ;;  %p896_p3 = scmp.lt.s32.totalorder %s1168_s26, 2 }
  0x44   : > { %s1567_s16 = smov (%p41_p13, %s39_s16), 0  ;;  %p1349_p7 = por %p1254_p2, %p55_p6 }
  0x45   : > { %p57_p5 = por %p56_p10, %p55_p6  ;;  %s43_s18 = ssub.s32 %s1164_s25, %s1567_s16 }
  0x46   : > { %s1553_s12 = scalar_select %p1349_p7, 1, 0 }
  0x47   : > { %s257_s19 = sand.u32 1, %s1156_s23   ;;  %p46_p9 = scmp.eq.s32.totalorder %s43_s18, 0 }
  0x48   : > { %s780_s14 = sshll.u32 %s257_s19, 3  ;;  %s781_s10 = sshll.u32 %s1164_s25, 7 }
  0x49   : > { %s1358_s13 = scalar_select %p46_p9, %s1156_s23, %s48_s17  }
  0x4a   : > { %s1363_s28 = scalar_lea.hbm %s1534_s0, %s781_s10  ;;  %s261_s30 = scalar_lea.vmem [#allocation2], %s780_s14 }
  0x4b   : > { %s269_s11 = sshll.u32 %s261_s30, 4  ;;  %p1367_p2 = pnand %p896_p3, %p57_p5  ;;  %s1371_s11 = int_to_ptr.vmem [resolvable:$true] %s269_s11 }
  0x4c   : > { %s258_s15 = scalar_lea.sflag [#allocation3], %s257_s19  ;;  %s1020_s17 = scalar_lea.hbm %s1363_s28, 128 }
  0x4d   : > { %p1021_p11 = scmp.ne.s32.totalorder %s1363_s28, %s1020_s17  ;;  %p1022_p12 = pneg %p1367_p2 }
  0x4e   : > { %s1025_s10 = scalar_lea.hbm %s1534_s0, 256  ;;  %p1026_p4 = scmp.lt.u32.totalorder %s1363_s28, %s1534_s0 }
  0x4f   : > { %p1023_p0 = pnand %p1022_p12, %p1021_p11  ;;  %p1027_p13 = scmp.lt.u32.totalorder %s1025_s10, %s1020_s17 }
  0x50   : > { %p1029_p10 = scmp.lt.u32.totalorder %s1020_s17, %s1363_s28 }
  0x51   : > { %p1024_p1 = pneg %p1023_p0  ;;  %p1028_p6 = por %p1027_p13, %p1026_p4 }
  0x53   : > { %p1030_p3 = por %p1029_p10, %p1028_p6 }
  0x55   : > { %p1031_p5 = pnand %p1030_p3, %p1024_p1 }
  0x57   : > { %1034 = shalt.err (!%p1031_p5)
}
  0x58   : > { %s1035_s19 = scalar_lea.vmem %s1371_s11, 128  ;;  %s1174_s30 = smov [#allocation2]  }
  0x59   : > { %p1036_p9 = scmp.ne.s32.totalorder %s1371_s11, %s1035_s19  ;;  %s1040_s18 = sshll.u32 %s1174_s30, 4  ;;  %s1041_s18 = int_to_ptr.vmem [resolvable:$false] %s1040_s18 }
  0x5a   : > { %s1042_s14 = scalar_lea.vmem %s1041_s18, 256  ;;  %p1043_p7 = scmp.lt.s32.totalorder %s1371_s11, %s1041_s18 }
  0x5b   : > { %p1038_p11 = pnand %p1036_p9, %p1022_p12  ;;  %p1044_p4 = scmp.lt.s32.totalorder %s1042_s14, %s1035_s19 }
  0x5d   : > { %p1039_p0 = pneg %p1038_p11  ;;  %p1045_p13 = por %p1044_p4, %p1043_p7 }
  0x5f   : > { %p1046_p6 = pnand %p1045_p13, %p1039_p0 }
  0x61   : > { %1049 = shalt.err (!%p1046_p6)
}
  0x62   : > { %886 = dma.hbm_to_vmem [thread:$0]  (!%p1367_p2), %s1363_s28, 128, %s1371_s11, %s258_s15  }
  0x63   : > { %278 = sbr.rel (%p1270_p8) target bundleno = 382 (0x17e), region = 40  ;;  %s1401_s17 = sand.u32 (!%p1270_p8), 1, %s1152_s22  }
  0x64   : > { %s1404_s10 = sshll.u32 (!%p1270_p8), %s1401_s17, 3  ;;  %s281_s20 = scalar_lea.sflag (!%p1270_p8), [#allocation3], %s1401_s17 }
  0x65   : > { %s284_s27 = scalar_lea.vmem (!%p1270_p8), [#allocation2], %s1404_s10  ;;  %p1555_p7 = scmp.ne.s32.totalorder (!%p1270_p8), %s1548_s7, 0 }
  0x6a   : > { %1131 = dma.done.wait (%p1555_p7), %s281_s20, 128  }
  0x6b   : > { %1133 = vsyncadd (%p1555_p7), %s281_s20, 4294967168  ;;  %p1556_p2 = scmp.ne.s32.totalorder %s1546_s29, 0 }
  0x6d   : > { %1135 = dma.done.wait (%p1556_p2), [#allocation6], 1024  }
  0x6e   : > { %1137 = vsyncadd (%p1556_p2), [#allocation6], 4294966272  ;;  %v1175_v0 = vmov 0.0   ;;  %vm1176_vm0 = vmmov 0   ;;  %v956_v1 = vld [vmem:[#allocation5] sm:$0xff]   ;;  %v958_v3 = vld [vmem:[#allocation5 + $0x8] sm:$0xff]  }
  0x6f   : > { %830 = vmatprep.subr.bf16.mxu0 %v1175_v0  ;;  %838 = vmatprep.subr.bf16.mxu1 %v1175_v0  ;;  %v957_v2 = vld [vmem:[#allocation7] sm:$0xff]   ;;  %v959_v4 = vld [vmem:[#allocation7 + $0x8] sm:$0xff]   ;;  %v327_v5 = vld [vmem:[%s284_s27] sm:$0xff]  ;;  %vm352_vm1 = vcmask 261120   ;;  %vm460_vm2 = vcmask 257024   ;;  %s318_s11 = scalar_lea.vmem [#allocation8], %s1404_s10 }
  0x70   : > { %834 = vmatprep.mubr.msk.bf16.mxu0 %vm1176_vm0, %v1175_v0  ;;  %842 = vmatprep.mubr.msk.bf16.mxu1 %vm1176_vm0, %v1175_v0  ;;  %v328_v6 = vpack.c.bf16 %v327_v5, %v327_v5  ;;  %v960_v7 = vld [vmem:[#allocation5 + $0x10] sm:$0xff]   ;;  %v962_v9 = vld [vmem:[#allocation5 + $0x18] sm:$0xff]   ;;  %s325_s8 = scalar_lea.vmem [#allocation9], %s1404_s10  ;;  %s816_s30 = sshll.u32 %s1160_s24, 7 }
  0x71   : > { %831 = vmatpush3.bf16.msra.mxu0 %v956_v1  ;;  %839 = vmatpush3.bf16.msra.mxu1 %v957_v2  ;;  %v961_v8 = vld [vmem:[#allocation7 + $0x10] sm:$0xff]   ;;  %v963_v10 = vld [vmem:[#allocation7 + $0x18] sm:$0xff]   ;;  %s620_s18 = sshll.u32 %s318_s11, 4  ;;  %s637_s27 = sshll.u32 %s325_s8, 4  ;;  %s1446_s18 = int_to_ptr.vmem [resolvable:$true] %s620_s18  ;;  %s1453_s27 = int_to_ptr.vmem [resolvable:$true] %s637_s27 }
  0x72   : > { %832 = vmatprep.subr.bf16.mxu0 %v1175_v0  ;;  %840 = vmatprep.subr.bf16.mxu1 %v1175_v0  ;;  %v788_v11 = vld [vmem:[%s1537_s3] ss:$0 sm:$0xff]  ;;  %v797_v25 = vld [vmem:[%s1537_s3 + $0x1] ss:$0 sm:$0xff]  ;;  %s1444_s7 = scalar_lea.hbm %s1539_s5, %s816_s30  ;;  %s1451_s28 = scalar_lea.hbm %s1540_s6, %s816_s30 }
  0x73   : > { %v792_v12 = vld [vmem:[%s1538_s4] ss:$0 sm:$0xff]  ;;  %v802_v26 = vld [vmem:[%s1538_s4 + $0x1] ss:$0 sm:$0xff]  ;;  %s601_s15 = scalar_lea.sflag [#allocation4], %s1401_s17  ;;  %s1050_s19 = scalar_lea.vmem %s1446_s18, 128 }
  0x74   : > { %p1051_p8 = scmp.ne.s32.totalorder %s1446_s18, %s1050_s19  ;;  %p1557_p12 = scmp.ne.s32.totalorder %s1553_s12, 0 }
  0x75   : > { %833 = vmatpush3.bf16.msra.mxu0 %v958_v3  ;;  %841 = vmatpush3.bf16.msra.mxu1 %v959_v4  ;;  %s1177_s14 = smov [#allocation8]  }
  0x76   : > { %846 = vmatprep.subr.bf16.mxu0 %v1175_v0  ;;  %854 = vmatprep.subr.bf16.mxu1 %v1175_v0  ;;  %p1052_p1 = pnand %p1051_p8, %p1557_p12  ;;  %s1054_s20 = sshll.u32 %s1177_s14, 4  ;;  %s1055_s20 = int_to_ptr.vmem [resolvable:$false] %s1054_s20 }
  0x77   : > { %s1056_s29 = scalar_lea.vmem %s1055_s20, 256  ;;  %p1057_p3 = scmp.lt.s32.totalorder %s1446_s18, %s1055_s20 }
  0x78   : > { %835 = vmatmul.mubr.msk.bf16.vlgmr.msra.gmra.mrb[0].mxu0 %vm352_vm1, %v328_v6  ;;  %843 = vmatmul.mubr.msk.bf16.vlgmr.msra.gmra.mrb[0].mxu1 %vm352_vm1, %v328_v6  ;;  %p1053_p10 = pneg %p1052_p1  ;;  %p1058_p5 = scmp.lt.s32.totalorder %s1056_s29, %s1050_s19 }
  0x79   : > { %847 = vmatpush3.bf16.msra.mxu0 %v960_v7  ;;  %855 = vmatpush3.bf16.msra.mxu1 %v961_v8 }
  0x7a   : > { %848 = vmatprep.subr.bf16.mxu0 %v1175_v0  ;;  %856 = vmatprep.subr.bf16.mxu1 %v1175_v0  ;;  %p1059_p9 = por %p1058_p5, %p1057_p3 }
  0x7b   : > { %850 = vmatprep.mubr.msk.bf16.mxu0 %vm1176_vm0, %v1175_v0  ;;  %858 = vmatprep.mubr.msk.bf16.mxu1 %vm1176_vm0, %v1175_v0 }
  0x7c   : > { %p1060_p11 = pnand %p1059_p9, %p1053_p10 }
  0x7d   : > { %849 = vmatpush3.bf16.msra.mxu0 %v962_v9  ;;  %857 = vmatpush3.bf16.msra.mxu1 %v963_v10 }
  0x80   : > { %851 = vmatmul.mubr.msk.bf16.vlgmr.msra.gmra.mrb[4].mxu0 %vm352_vm1, %v328_v6  ;;  %859 = vmatmul.mubr.msk.bf16.vlgmr.msra.gmra.mrb[4].mxu1 %vm352_vm1, %v328_v6 }
 0x14b   : > { %v390_v13 = vpop.f32.mrb[0].mxu0  ;;  %v453_v15 = vpop.f32.mrb[0].mxu1 }
 0x14c   : > { %v391_v14 = vadd.f32 %v788_v11, %v390_v13  ;;  %v836_v16 = vpop.f32.mrb[1].mxu0  ;;  %v454_v17 = vadd.f32 %v792_v12, %v453_v15  ;;  %v844_v18 = vpop.f32.mrb[1].mxu1 }
 0x14d   : > { %v393_v19 = vpop.f32.mrb[2].mxu0  ;;  %v456_v21 = vpop.f32.mrb[2].mxu1 }
 0x14e   : > { %v459_v20 = vpack.c.bf16 %v391_v14, %v391_v14  ;;  %v837_v22 = vpop.f32.mrb[3].mxu0  ;;  %v462_v23 = vpack.c.bf16 %v454_v17, %v454_v17  ;;  %v845_v24 = vpop.f32.mrb[3].mxu1 }
 0x150   : > { %461 = vst.msk [vmem:[%s318_s11] sm:$0xf] %vm460_vm2, %v459_v20  ;;  %463 = vst.msk [vmem:[%s325_s8] sm:$0xf] %vm460_vm2, %v462_v23 }
 0x153   : > { %v523_v27 = vpop.f32.mrb[4].mxu0  ;;  %v588_v29 = vpop.f32.mrb[4].mxu1 }
 0x154   : > { %v524_v28 = vadd.f32 %v797_v25, %v523_v27  ;;  %v852_v30 = vpop.f32.mrb[5].mxu0  ;;  %v589_v31 = vadd.f32 %v802_v26, %v588_v29  ;;  %v860_v32 = vpop.f32.mrb[5].mxu1 }
 0x155   : > { %v526_v33 = vpop.f32.mrb[6].mxu0  ;;  %v591_v35 = vpop.f32.mrb[6].mxu1 }
 0x156   : > { %v594_v34 = vpack.c.bf16 %v524_v28, %v524_v28  ;;  %v853_v36 = vpop.f32.mrb[7].mxu0  ;;  %v597_v37 = vpack.c.bf16 %v589_v31, %v589_v31  ;;  %v861_v38 = vpop.f32.mrb[7].mxu1 }
 0x158   : > { %806 = vst.msk [vmem:[%s318_s11 + $0x4] sm:$0xf] %vm460_vm2, %v594_v34  ;;  %807 = vst.msk [vmem:[%s325_s8 + $0x4] sm:$0xf] %vm460_vm2, %v597_v37 }
 0x159   : > { %1063 = shalt.err (!%p1060_p11)
}
 0x15a   : > { %s1064_s11 = scalar_lea.hbm %s1444_s7, 128  ;;  %s1068_s10 = scalar_lea.hbm %s1539_s5, 256 }
 0x15b   : > { %p1065_p0 = scmp.ne.s32.totalorder %s1444_s7, %s1064_s11  ;;  %p1069_p6 = scmp.lt.u32.totalorder %s1444_s7, %s1539_s5 }
 0x15c   : > { %p1070_p7 = scmp.lt.u32.totalorder %s1068_s10, %s1064_s11  ;;  %p1072_p8 = scmp.lt.u32.totalorder %s1064_s11, %s1444_s7 }
 0x15d   : > { %p1066_p4 = pnand %p1065_p0, %p1557_p12 }
 0x15e   : > { %p1071_p2 = por %p1070_p7, %p1069_p6 }
 0x15f   : > { %p1067_p13 = pneg %p1066_p4 }
 0x160   : > { %p1073_p1 = por %p1072_p8, %p1071_p2 }
 0x162   : > { %p1074_p10 = pnand %p1073_p1, %p1067_p13 }
 0x164   : > { %1077 = shalt.err (!%p1074_p10)
}
 0x165   : > { %s1178_s19 = smov 64   ;;  %s1179_s14 = smov 4  }
 0x166   : > { %872 = dma.vmem_to_hbm [thread:$0]  (%p1557_p12), %s1446_s18, 128, %s1444_s7, %s601_s15, %s1178_s19, %s1178_s19, %s1179_s14  }
 0x167   : > { %s606_s20 = scalar_lea.sflag [#allocation10], %s1401_s17  ;;  %s1078_s29 = scalar_lea.vmem %s1453_s27, 128 }
 0x168   : > { %p1079_p3 = scmp.ne.s32.totalorder %s1453_s27, %s1078_s29  ;;  %s1180_s11 = smov [#allocation9]  }
 0x169   : > { %s1082_s8 = sshll.u32 %s1180_s11, 4  ;;  %s1083_s8 = int_to_ptr.vmem [resolvable:$false] %s1082_s8 }
 0x16a   : > { %p1080_p5 = pnand %p1079_p3, %p1557_p12  ;;  %s1084_s30 = scalar_lea.vmem %s1083_s8, 256 }
 0x16b   : > { %p1085_p11 = scmp.lt.s32.totalorder %s1453_s27, %s1083_s8  ;;  %p1086_p0 = scmp.lt.s32.totalorder %s1084_s30, %s1078_s29 }
 0x16c   : > { %p1081_p9 = pneg %p1080_p5 }
 0x16d   : > { %p1087_p4 = por %p1086_p0, %p1085_p11 }
 0x16f   : > { %p1088_p13 = pnand %p1087_p4, %p1081_p9 }
 0x171   : > { %1091 = shalt.err (!%p1088_p13)
}
 0x172   : > { %s1092_s18 = scalar_lea.hbm %s1451_s28, 128  ;;  %s1096_s10 = scalar_lea.hbm %s1540_s6, 256 }
 0x173   : > { %p1093_p6 = scmp.ne.s32.totalorder %s1451_s28, %s1092_s18  ;;  %p1097_p8 = scmp.lt.u32.totalorder %s1451_s28, %s1540_s6 }
 0x174   : > { %p1098_p1 = scmp.lt.u32.totalorder %s1096_s10, %s1092_s18  ;;  %p1100_p3 = scmp.lt.u32.totalorder %s1092_s18, %s1451_s28 }
 0x175   : > { %p1094_p7 = pnand %p1093_p6, %p1557_p12 }
 0x176   : > { %p1099_p10 = por %p1098_p1, %p1097_p8 }
 0x177   : > { %p1095_p2 = pneg %p1094_p7 }
 0x178   : > { %p1101_p5 = por %p1100_p3, %p1099_p10 }
 0x17a   : > { %p1102_p9 = pnand %p1101_p5, %p1095_p2 }
 0x17c   : > { %1105 = shalt.err (!%p1102_p9)
}
 0x17d   : > { %873 = dma.vmem_to_hbm [thread:$0]  (%p1557_p12), %s1453_s27, 128, %s1451_s28, %s606_s20, %s1178_s19, %s1178_s19, %s1179_s14  }
 0x17e PF: > { %s1558_s29 = sld [smem:[#allocation15_spill]]  ;;  %s652_s11 = sand.u32 1, %s1148_s21  }
 0x17f   : > { %p1560_p0 = scmp.ge.s32.totalorder %s1168_s26, 2  ;;  %s653_s8 = scalar_lea.sflag [#allocation4], %s652_s11 }
 0x184   : > { %p1559_p11 = scmp.ne.s32.totalorder %s1558_s29, 0 }
 0x186   : > { %p888_p4 = pnand %p1560_p0, %p1559_p11 }
 0x188   : > { %1139 = dma.done.wait (!%p888_p4), %s653_s8, 128  }
 0x189   : > { %1141 = vsyncadd (!%p888_p4), %s653_s8, 4294967168  ;;  %s662_s12 = scalar_lea.sflag [#allocation10], %s652_s11 }
 0x18a   : > { %1143 = dma.done.wait (!%p888_p4), %s662_s12, 128  }
 0x18b   : > { %1145 = vsyncadd (!%p888_p4), %s662_s12, 4294967168  ;;  %s27_s26 = sadd.s32 1, %s1168_s26   ;;  %s1561_s21 = smov %s1152_s22 }
 0x18c   : > { %p24_p13 = scmp.ge.s32.totalorder %s27_s26, 4   ;;  %s1562_s22 = smov %s1156_s23 }
 0x18d   : > { %s1563_s23 = smov %s1358_s13  ;;  %s1564_s24 = smov %s1164_s25 }
 0x18e   : > { %s1565_s25 = smov %s1567_s16  ;;  %26 = sbr.rel (!%p24_p13) target bundleno = 9 (0x9), region = 116 }
 0x195   :  { %667 = vsyncpa [#allocation3], 1 }
 0x196   :  { %669 = vsyncpa [#allocation3 + $0x1], 1 }
 0x197   :  { %670 = vsyncpa [#allocation6], 1 }
 0x198   :  { %671 = vsyncpa [#allocation4], 1 }
 0x199   :  { %673 = vsyncpa [#allocation4 + $0x1], 1 }
 0x19a   :  { %674 = vsyncpa [#allocation10], 1 }
 0x19b   :  { %676 = vsyncpa [#allocation10 + $0x1], 1 }

</bundles_post_ra>
